<compile_context>
chip_gen: v5e
topology: v5e:2x2
jax: 0.10.0
libtpu: 0.0.40
codegen_flags: <defaults>
</compile_context>

<pallas_src>
import functools

import jax
import jax.numpy as jnp
from jax.experimental import pallas as pl
from jax.experimental.pallas import tpu as pltpu

_NEG = -1e30  # additive / fill value that zeroes a softmax lane


def _round_up(x, m):
    return ((x + m - 1) // m) * m


def _hbd_loss_kernel(t, label_smoothing, n_valid_rows,
                     apply_row_mask, apply_dv_mask,
                     labels_ref, cw_ref, dvb_ref, vlogits_ref, vstate_ref,
                     bstate_ref, wfit_ref,
                     out_ref,
                     acc_wnll, acc_w, acc_smooth, acc_kl):
    c = pl.program_id(0)          # core-split axis ("parallel")
    i = pl.program_id(1)          # batch-tile reduction axis ("arbitrary")
    n_i = pl.num_programs(1)

    # ---- init per-core scalar accumulators on the first batch tile ---------
    @pl.when(i == 0)
    def _init():
        acc_wnll[...] = jnp.zeros_like(acc_wnll)
        acc_w[...] = jnp.zeros_like(acc_w)
        acc_smooth[...] = jnp.zeros_like(acc_smooth)
        acc_kl[...] = jnp.zeros_like(acc_kl)

    logits = vlogits_ref[...].astype(jnp.float32)                 # [tb, Kp]
    tb, K = logits.shape

    # Validity mask for the padded batch tail (trace-time skipped if unneeded).
    if apply_row_mask:
        start = (c * n_i + i) * tb
        rows = start + jax.lax.broadcasted_iota(jnp.int32, (tb, 1), 0)
        valid = (rows < n_valid_rows).astype(jnp.float32)          # [tb, 1]
    else:
        valid = None

    # ---- weighted (+ label-smoothed) cross entropy, partial sums -----------
    # logp is never materialized:
    #   w_y * nll = lse*w_y - sum(onehot*cw*z);  smooth = lse*sum(cw) - sum(cw*z)
    m = jnp.max(logits, axis=-1, keepdims=True)
    z = logits - m
    lse = jnp.log(jnp.sum(jnp.exp(z), axis=-1, keepdims=True))     # [tb, 1]

    labels = labels_ref[...]                                       # [tb, 1] int32
    cw = cw_ref[...].astype(jnp.float32)                           # [1, Kp]
    onehot = jax.lax.broadcasted_iota(jnp.int32, (tb, K), 1) == labels
    ocw = jnp.where(onehot, cw, 0.0)                               # cw[y] at label lane
    w_y = jnp.sum(ocw, axis=-1, keepdims=True)                     # [tb, 1]
    wnll = lse * w_y - jnp.sum(ocw * z, axis=-1, keepdims=True)    # w_y * (-log p_y)
    if apply_row_mask:
        w_y = w_y * valid
        wnll = wnll * valid
    acc_w[...] += jnp.sum(w_y)
    acc_wnll[...] += jnp.sum(wnll)

    if label_smoothing != 0.0:   # trace-time guard: no [tb,K] work when LS == 0
        smooth = (lse * jnp.sum(cw, axis=-1, keepdims=True)
                  - jnp.sum(cw * z, axis=-1, keepdims=True))
        if apply_row_mask:
            smooth = smooth * valid
        acc_smooth[...] += jnp.sum(smooth)

    # ---- fit_layer: brain_state @ W_fit^T (nn.Linear, bias=False) ----------
    # Operands keep their HBM dtype (bf16 feeds the MXU natively); f32 accum.
    bfit = jnp.dot(bstate_ref[...], wfit_ref[...],
                   preferred_element_type=jnp.float32)             # [tb, Dvp]
    # TODO(synk): training-mode Dropout(0.5) after fit_layer not applied
    # (eval/identity semantics); a training variant would use pltpu.prng_seed
    # + pltpu.prng_random_bits.
    if apply_dv_mask:
        bfit = bfit + dvb_ref[...]          # -1e30 bias on padded Dv lanes

    # ---- DistillLoss: -sum(log_softmax(v/t) * softmax(bfit/t), -1) ----------
    # Rewritten so neither log_softmax nor softmax is materialized:
    #   kl_row = lse_v - sum(vz * be) / sum(be)
    inv_t = 1.0 / t
    vs = vstate_ref[...].astype(jnp.float32) * inv_t
    vm = jnp.max(vs, axis=-1, keepdims=True)
    vz = vs - vm
    lse_v = jnp.log(jnp.sum(jnp.exp(vz), axis=-1, keepdims=True))  # [tb, 1]

    bs = bfit * inv_t
    bm = jnp.max(bs, axis=-1, keepdims=True)
    be = jnp.exp(bs - bm)                                          # [tb, Dvp]
    se = jnp.sum(be, axis=-1, keepdims=True)
    swz = jnp.sum(vz * be, axis=-1, keepdims=True)
    # EUP-approx reciprocal keeps the divide off the VALU critical path.
    kl_row = lse_v - swz * pl.reciprocal(se, approx=True)          # [tb, 1]
    if apply_row_mask:
        kl_row = kl_row * valid
    acc_kl[...] += jnp.sum(kl_row)

    # ---- finalize: one lane-dense (8,128) partial-sum block per core -------
    @pl.when(i == n_i - 1)
    def _finalize():
        lane = jax.lax.broadcasted_iota(jnp.int32, (8, 128), 1)
        row = jnp.where(lane == 0, acc_wnll[0, 0],
              jnp.where(lane == 1, acc_w[0, 0],
              jnp.where(lane == 2, acc_smooth[0, 0],
              jnp.where(lane == 3, acc_kl[0, 0], 0.0))))
        out_ref[...] = row                                         # single unmasked vst


def hbd_distill_loss(vision_logits, labels, class_weight,
                     vision_state, brain_state, w_fit_t,
                     *, t=3.0, lam=0.5, label_smoothing=0.0):
    """Computes (total_loss, ce_loss, kl_loss) of HBD.distill in one Pallas call."""
    B, K = vision_logits.shape
    Dv = vision_state.shape[1]
    Db = brain_state.shape[1]
    assert w_fit_t.shape == (Db, Dv)
    assert vision_state.shape[0] == B and brain_state.shape[0] == B

    # MXU needs matching operand dtypes; only the (small) weight is cast —
    # the big activations are never up-cast on the host side.
    if w_fit_t.dtype != brain_state.dtype:
        w_fit_t = w_fit_t.astype(brain_state.dtype)

    # ---- lane-pad feature dims to multiples of 128 (dense vregs / MXU) -----
    Kp, Dvp, Dbp = _round_up(K, 128), _round_up(Dv, 128), _round_up(Db, 128)
    cw_p = jnp.pad(class_weight.reshape(1, K).astype(jnp.float32),
                   ((0, 0), (0, Kp - K)))                           # pad weights = 0
    vl_p = jnp.pad(vision_logits, ((0, 0), (0, Kp - K)), constant_values=_NEG)
    vs_p = jnp.pad(vision_state, ((0, 0), (0, Dvp - Dv)), constant_values=_NEG)
    bs_p = jnp.pad(brain_state, ((0, 0), (0, Dbp - Db)))            # contract dim: 0
    wf_p = jnp.pad(w_fit_t, ((0, Dbp - Db), (0, Dvp - Dv)))
    # Additive bias that kills the padded Dv lanes of brain_state @ W^T.
    dv_bias = jnp.where(jnp.arange(Dvp)[None, :] < Dv, 0.0, _NEG).astype(jnp.float32)

    # ---- batch tile from a generation-aware VMEM budget ---------------------
    try:
        vmem_cap = int(pltpu.get_tpu_info().vmem_capacity_bytes)
    except Exception:
        vmem_cap = 64 * 1024 * 1024           # conservative (v7x per-core VMEM)
    vmem_budget = min(vmem_cap // 2, 96 * 1024 * 1024)   # ~32 MiB v7x / 64 MiB v5e,v6e

    resident = (wf_p.size * wf_p.dtype.itemsize          # single-buffered weight
                + (Kp + Dvp) * 4)                        # class weights + dv bias
    per_row = 2 * (Kp * vl_p.dtype.itemsize              # double-buffered input blocks
                   + Dvp * vs_p.dtype.itemsize
                   + Dbp * bs_p.dtype.itemsize + 4)      # + labels
    per_row += 4 * (Kp + 2 * Dvp)                        # f32 temporaries headroom

    quantum = 16 if any(a.dtype == jnp.bfloat16 for a in (vl_p, vs_p, bs_p)) else 8
    NC = 2                                               # both TensorCores on v7x
    rows_per_core = -(-B // NC)
    tb_budget = max(quantum, (vmem_budget - resident) // per_row)
    tb = min(_round_up(rows_per_core, quantum),
             (tb_budget // quantum) * quantum, 2048)
    tb = max(tb, quantum)
    n_i = -(-rows_per_core // tb)                        # batch tiles per core
    Bp = NC * n_i * tb                                   # padded batch

    pad_rows = Bp - B
    labels2 = jnp.pad(labels.astype(jnp.int32), (0, pad_rows)).reshape(Bp, 1)
    vl_p = jnp.pad(vl_p, ((0, pad_rows), (0, 0)))
    vs_p = jnp.pad(vs_p, ((0, pad_rows), (0, 0)))
    bs_p = jnp.pad(bs_p, ((0, pad_rows), (0, 0)))

    kernel = functools.partial(_hbd_loss_kernel, float(t), float(label_smoothing),
                               int(B), bool(pad_rows > 0), bool(Dvp > Dv))

    batch_idx = lambda c, i: (c * n_i + i, 0)
    const_idx = lambda c, i: (0, 0)
    # Constant-index_map operands never change across the grid: single-buffer
    # them (no second pipeline buffer -> critical under v7x's 64 MiB VMEM).
    resident_mode = dict(pipeline_mode=pl.Buffered(1))

    # Advisory cost estimate so XLA can overlap this call with encoder GEMMs.
    flops = int(2 * Bp * Dbp * Dvp + 10 * Bp * (Kp + Dvp))
    transcendentals = int(Bp * (Kp + Dvp + 2))
    bytes_accessed = int(vl_p.nbytes + vs_p.nbytes + bs_p.nbytes + wf_p.nbytes
                         + labels2.nbytes + cw_p.nbytes + dv_bias.nbytes
                         + NC * 8 * 128 * 4)

    out = pl.pallas_call(
        kernel,
        grid=(NC, n_i),
        in_specs=[
            pl.BlockSpec((tb, 1), batch_idx),                      # labels
            pl.BlockSpec((1, Kp), const_idx, **resident_mode),     # class weights
            pl.BlockSpec((1, Dvp), const_idx, **resident_mode),    # dv pad bias
            pl.BlockSpec((tb, Kp), batch_idx),                     # vision logits
            pl.BlockSpec((tb, Dvp), batch_idx),                    # vision state
            pl.BlockSpec((tb, Dbp), batch_idx),                    # brain state
            pl.BlockSpec((Dbp, Dvp), const_idx, **resident_mode),  # w_fit^T
        ],
        out_specs=pl.BlockSpec((8, 128), lambda c, i: (c, 0)),     # per-core partials
        out_shape=jax.ShapeDtypeStruct((NC * 8, 128), jnp.float32),
        scratch_shapes=[pltpu.VMEM((1, 1), jnp.float32)] * 4,      # wnll, w, smooth, kl
        compiler_params=pltpu.CompilerParams(
            dimension_semantics=("parallel", "arbitrary"),
            vmem_limit_bytes=int(vmem_budget)),
        cost_estimate=pl.CostEstimate(flops=flops,
                                      transcendentals=transcendentals,
                                      bytes_accessed=bytes_accessed),
    )(labels2, cw_p, dv_bias, vl_p, vs_p, bs_p, wf_p)

    parts = out.reshape(NC, 8, 128)[:, 0, :]                       # [NC, 128]
    wnll = parts[:, 0].sum()
    w_sum = parts[:, 1].sum()
    smooth = parts[:, 2].sum()
    kl_sum = parts[:, 3].sum()

    # Guard against all target-class weights being zero (PyTorch would give
    # NaN here; we return a finite 0/1-denominator value instead).
    safe = jnp.where(w_sum != 0.0, w_sum, 1.0)
    ce = (1.0 - label_smoothing) * (wnll / safe)
    if label_smoothing != 0.0:
        ce = ce + (label_smoothing / K) * (smooth / safe)
    kl = kl_sum / B
    loss = ce + lam * kl
    return loss, ce, kl


class LinearEncoder:
    """Deterministic stand-in for the injected vision / brain encoders.

    Returns (logits, hidden_state) like the encoders HBD expects.  These are
    external dependencies of HBD (not its own parameters), so they live in
    plain-JAX glue; the HBD compute itself is in the Pallas kernel above.
    """

    def __init__(self, key, d_in, n_classes, d_hidden):
        k1, k2 = jax.random.split(key)
        self.w_logits = 0.02 * jax.random.normal(k1, (d_in, n_classes), jnp.float32)
        self.w_state = 0.02 * jax.random.normal(k2, (d_in, d_hidden), jnp.float32)

    def __call__(self, x):
        return x @ self.w_logits, x @ self.w_state


if __name__ == "__main__":
    key = jax.random.PRNGKey(0)
    keys = jax.random.split(key, 6)

    # Small shapes consistent with the module's forward.
    B, C, H, W = 8, 4, 16, 16          # images (NCHW)
    Ds = 64                            # brain signal features
    K = 10                             # number of classes
    Dv = 32                            # vision_config.d_hidden
    Db = 48                            # brain_config.d_hidden
    T, LAM, LS = 3.0, 0.5, 0.1

    images = jax.random.normal(keys[0], (B, C, H, W), jnp.float32)
    brain_signals = jax.random.normal(keys[1], (B, Ds), jnp.float32)
    labels = jax.random.randint(keys[2], (B,), 0, K, dtype=jnp.int32)
    class_weight = jnp.linspace(0.5, 1.5, K, dtype=jnp.float32)   # config.class_weight

    vision_encoder = LinearEncoder(keys[3], C * H * W, K, Dv)
    brain_encoder = LinearEncoder(keys[4], Ds, K, Db)

    # fit_layer = nn.Linear(Db, Dv, bias=False): weight shape [Dv, Db].
    # Pass its transpose so the kernel computes brain_state @ W^T as a plain matmul.
    w_fit = 0.02 * jax.random.normal(keys[5], (Dv, Db), jnp.float32)
    w_fit_t = w_fit.T

    # distill-mode forward (intended semantics; the reference forward's
    # argument-order bug in self.distill(...) is not reproduced).
    vision_logits, vision_state = vision_encoder(images.reshape(B, -1))
    _brain_logits, brain_state = brain_encoder(brain_signals)

    loss, ce, kl = hbd_distill_loss(
        vision_logits, labels, class_weight, vision_state, brain_state, w_fit_t,
        t=T, lam=LAM, label_smoothing=LS)
    jax.block_until_ready(loss)

    # Pure-JAX reference (same math) as a sanity check.
    logp = jax.nn.log_softmax(vision_logits.astype(jnp.float32), axis=-1)
    onehot = jax.nn.one_hot(labels, K, dtype=jnp.float32)
    w_y = (onehot * class_weight[None, :]).sum(-1)
    nll = -(onehot * logp).sum(-1)
    w_sum = w_y.sum()
    nll_mean = (w_y * nll).sum() / w_sum
    smooth_mean = (-(logp * class_weight[None, :]).sum(-1)).sum() / w_sum
    ce_ref = (1.0 - LS) * nll_mean + (LS / K) * smooth_mean
    bfit = brain_state @ w_fit_t
    vlp = jax.nn.log_softmax(vision_state / T, axis=-1)
    bsm = jax.nn.softmax(bfit / T, axis=-1)
    kl_ref = (-(vlp * bsm).sum(-1)).mean()
    loss_ref = ce_ref + LAM * kl_ref

    assert jnp.isfinite(loss) and jnp.isfinite(ce) and jnp.isfinite(kl)
    assert jnp.allclose(loss, loss_ref, rtol=1e-2, atol=1e-2)
    assert jnp.allclose(ce, ce_ref, rtol=1e-2, atol=1e-2)
    assert jnp.allclose(kl, kl_ref, rtol=1e-2, atol=1e-2)
    print("KERNEL_OK")
</pallas_src>

<mosaic_0001>
module attributes {stable_mosaic.version = 11 : i64} {
  func.func @_hbd_loss_kernel(%arg0: i32, %arg1: i32, %arg2: memref<8x1xi32, #tpu.memory_space<vmem>>, %arg3: memref<1x128xf32, #tpu.memory_space<vmem>>, %arg4: memref<1x128xf32, #tpu.memory_space<vmem>>, %arg5: memref<8x128xf32, #tpu.memory_space<vmem>>, %arg6: memref<8x128xf32, #tpu.memory_space<vmem>>, %arg7: memref<8x128xf32, #tpu.memory_space<vmem>>, %arg8: memref<128x128xf32, #tpu.memory_space<vmem>>, %arg9: memref<8x128xf32, #tpu.memory_space<vmem>>, %arg10: memref<1x1xf32, #tpu.memory_space<vmem>>, %arg11: memref<1x1xf32, #tpu.memory_space<vmem>>, %arg12: memref<1x1xf32, #tpu.memory_space<vmem>>, %arg13: memref<1x1xf32, #tpu.memory_space<vmem>>) attributes {dimension_semantics = [#tpu.dimension_semantics<parallel>, #tpu.dimension_semantics<arbitrary>], iteration_bounds = array<i64: 2, 1>, scalar_prefetch = 0 : i64, scratch_operands = 4 : i64, tpu.core_type = #tpu.core_type<tc>, window_params = [{transform_indices = @transform_0, window_bounds = array<i64: 8, 1>}, {pipeline_mode = #tpu.pipeline_mode<synchronous>, transform_indices = @transform_1, window_bounds = array<i64: 1, 128>}, {pipeline_mode = #tpu.pipeline_mode<synchronous>, transform_indices = @transform_2, window_bounds = array<i64: 1, 128>}, {transform_indices = @transform_3, window_bounds = array<i64: 8, 128>}, {transform_indices = @transform_4, window_bounds = array<i64: 8, 128>}, {transform_indices = @transform_5, window_bounds = array<i64: 8, 128>}, {pipeline_mode = #tpu.pipeline_mode<synchronous>, transform_indices = @transform_6, window_bounds = array<i64: 128, 128>}, {transform_indices = @transform_7, window_bounds = array<i64: 8, 128>}]} {
    %c0_i32 = arith.constant 0 : i32
    %0 = arith.cmpi eq, %arg1, %c0_i32 : i32
    %1 = arith.extui %0 : i1 to i32
    %c0_i32_0 = arith.constant 0 : i32
    %2 = arith.cmpi ne, %1, %c0_i32_0 : i32
    scf.if %2 {
      %cst_51 = arith.constant 0.000000e+00 : f32
      %118 = vector.broadcast %cst_51 : f32 to vector<1x1xf32>
      %c0_52 = arith.constant 0 : index
      %c0_53 = arith.constant 0 : index
      %119 = vector.load %arg10[%c0_52, %c0_53] : memref<1x1xf32, #tpu.memory_space<vmem>>, vector<1x1xf32>
      tpu.vector_store %arg10[%c0_52, %c0_53], %118 {strides = array<i32>} : memref<1x1xf32, #tpu.memory_space<vmem>>, vector<1x1xf32>,
      %cst_54 = arith.constant 0.000000e+00 : f32
      %120 = vector.broadcast %cst_54 : f32 to vector<1x1xf32>
      %c0_55 = arith.constant 0 : index
      %c0_56 = arith.constant 0 : index
      %121 = vector.load %arg11[%c0_55, %c0_56] : memref<1x1xf32, #tpu.memory_space<vmem>>, vector<1x1xf32>
      tpu.vector_store %arg11[%c0_55, %c0_56], %120 {strides = array<i32>} : memref<1x1xf32, #tpu.memory_space<vmem>>, vector<1x1xf32>,
      %cst_57 = arith.constant 0.000000e+00 : f32
      %122 = vector.broadcast %cst_57 : f32 to vector<1x1xf32>
      %c0_58 = arith.constant 0 : index
      %c0_59 = arith.constant 0 : index
      %123 = vector.load %arg12[%c0_58, %c0_59] : memref<1x1xf32, #tpu.memory_space<vmem>>, vector<1x1xf32>
      tpu.vector_store %arg12[%c0_58, %c0_59], %122 {strides = array<i32>} : memref<1x1xf32, #tpu.memory_space<vmem>>, vector<1x1xf32>,
      %cst_60 = arith.constant 0.000000e+00 : f32
      %124 = vector.broadcast %cst_60 : f32 to vector<1x1xf32>
      %c0_61 = arith.constant 0 : index
      %c0_62 = arith.constant 0 : index
      %125 = vector.load %arg13[%c0_61, %c0_62] : memref<1x1xf32, #tpu.memory_space<vmem>>, vector<1x1xf32>
      tpu.vector_store %arg13[%c0_61, %c0_62], %124 {strides = array<i32>} : memref<1x1xf32, #tpu.memory_space<vmem>>, vector<1x1xf32>,
    } else {
    }
    %c0 = arith.constant 0 : index
    %c0_1 = arith.constant 0 : index
    %3 = vector.load %arg5[%c0, %c0_1] : memref<8x128xf32, #tpu.memory_space<vmem>>, vector<8x128xf32>
    %c1_i32 = arith.constant 1 : i32
    %4 = arith.muli %arg0, %c1_i32 : i32
    %5 = arith.addi %4, %arg1 : i32
    %c8_i32 = arith.constant 8 : i32
    %6 = arith.muli %5, %c8_i32 : i32
    %7 = tpu.iota {dimensions = array<i32: 0>} : vector<8x1xi32>
    %8 = vector.broadcast %6 : i32 to vector<8x1xi32>
    %9 = arith.addi %8, %7 : vector<8x1xi32>
    %c8_i32_2 = arith.constant 8 : i32
    %10 = vector.broadcast %c8_i32_2 : i32 to vector<8x1xi32>
    %11 = arith.cmpi slt, %9, %10 : vector<8x1xi32>
    %12 = arith.extui %11 : vector<8x1xi1> to vector<8x1xi32>
    %13 = arith.sitofp %12 : vector<8x1xi32> to vector<8x1xf32>
    %cst = arith.constant dense<0xFF800000> : vector<8xf32>
    %14 = vector.multi_reduction <maximumf>, %3, %cst [1] : vector<8x128xf32> to vector<8xf32>
    %15 = vector.shape_cast %14 : vector<8xf32> to vector<8x1xf32>
    %16 = vector.broadcast %15 : vector<8x1xf32> to vector<8x128xf32>
    %17 = arith.subf %3, %16 : vector<8x128xf32>
    %18 = math.exp %17 : vector<8x128xf32>
    %cst_3 = arith.constant dense<0.000000e+00> : vector<8xf32>
    %19 = vector.multi_reduction <add>, %18, %cst_3 [1] : vector<8x128xf32> to vector<8xf32>
    %20 = vector.shape_cast %19 : vector<8xf32> to vector<8x1xf32>
    %21 = math.log %20 : vector<8x1xf32>
    %c0_4 = arith.constant 0 : index
    %c0_5 = arith.constant 0 : index
    %22 = vector.load %arg2[%c0_4, %c0_5] : memref<8x1xi32, #tpu.memory_space<vmem>>, vector<8x1xi32>
    %c0_6 = arith.constant 0 : index
    %c0_7 = arith.constant 0 : index
    %23 = vector.load %arg3[%c0_6, %c0_7] : memref<1x128xf32, #tpu.memory_space<vmem>>, vector<1x128xf32>
    %24 = tpu.iota {dimensions = array<i32: 1>} : vector<8x128xi32>
    %25 = vector.broadcast %22 : vector<8x1xi32> to vector<8x128xi32>
    %26 = arith.cmpi eq, %24, %25 : vector<8x128xi32>
    %cst_8 = arith.constant 0.000000e+00 : f32
    %27 = vector.shape_cast %23 : vector<1x128xf32> to vector<1x128xf32>
    %28 = vector.broadcast %27 : vector<1x128xf32> to vector<8x128xf32>
    %29 = vector.broadcast %cst_8 : f32 to vector<8x128xf32>
    %30 = arith.select %26, %28, %29 : vector<8x128xi1>, vector<8x128xf32>
    %cst_9 = arith.constant dense<0.000000e+00> : vector<8xf32>
    %31 = vector.multi_reduction <add>, %30, %cst_9 [1] : vector<8x128xf32> to vector<8xf32>
    %32 = vector.shape_cast %31 : vector<8xf32> to vector<8x1xf32>
    %33 = arith.mulf %21, %32 : vector<8x1xf32>
    %34 = arith.mulf %30, %17 : vector<8x128xf32>
    %cst_10 = arith.constant dense<0.000000e+00> : vector<8xf32>
    %35 = vector.multi_reduction <add>, %34, %cst_10 [1] : vector<8x128xf32> to vector<8xf32>
    %36 = vector.shape_cast %35 : vector<8xf32> to vector<8x1xf32>
    %37 = arith.subf %33, %36 : vector<8x1xf32>
    %38 = arith.mulf %32, %13 : vector<8x1xf32>
    %39 = arith.mulf %37, %13 : vector<8x1xf32>
    %c0_11 = arith.constant 0 : index
    %c0_12 = arith.constant 0 : index
    %40 = vector.load %arg11[%c0_11, %c0_12] : memref<1x1xf32, #tpu.memory_space<vmem>>, vector<1x1xf32>
    %41 = vector.shape_cast %38 : vector<8x1xf32> to vector<1x8x1xf32>
    %cst_13 = arith.constant dense<0.000000e+00> : vector<1xf32>
    %42 = vector.multi_reduction <add>, %41, %cst_13 [1, 2] : vector<1x8x1xf32> to vector<1xf32>
    %43 = vector.shape_cast %42 : vector<1xf32> to vector<1x1x1xf32>
    %44 = vector.extract %43[0, 0, 0] : f32 from vector<1x1x1xf32>
    %45 = vector.broadcast %44 : f32 to vector<1x1xf32>
    %46 = arith.addf %40, %45 : vector<1x1xf32>
    %c0_14 = arith.constant 0 : index
    %c0_15 = arith.constant 0 : index
    %47 = vector.load %arg11[%c0_14, %c0_15] : memref<1x1xf32, #tpu.memory_space<vmem>>, vector<1x1xf32>
    tpu.vector_store %arg11[%c0_14, %c0_15], %46 {strides = array<i32>} : memref<1x1xf32, #tpu.memory_space<vmem>>, vector<1x1xf32>,
    %c0_16 = arith.constant 0 : index
    %c0_17 = arith.constant 0 : index
    %48 = vector.load %arg10[%c0_16, %c0_17] : memref<1x1xf32, #tpu.memory_space<vmem>>, vector<1x1xf32>
    %49 = vector.shape_cast %39 : vector<8x1xf32> to vector<1x8x1xf32>
    %cst_18 = arith.constant dense<0.000000e+00> : vector<1xf32>
    %50 = vector.multi_reduction <add>, %49, %cst_18 [1, 2] : vector<1x8x1xf32> to vector<1xf32>
    %51 = vector.shape_cast %50 : vector<1xf32> to vector<1x1x1xf32>
    %52 = vector.extract %51[0, 0, 0] : f32 from vector<1x1x1xf32>
    %53 = vector.broadcast %52 : f32 to vector<1x1xf32>
    %54 = arith.addf %48, %53 : vector<1x1xf32>
    %c0_19 = arith.constant 0 : index
    %c0_20 = arith.constant 0 : index
    %55 = vector.load %arg10[%c0_19, %c0_20] : memref<1x1xf32, #tpu.memory_space<vmem>>, vector<1x1xf32>
    tpu.vector_store %arg10[%c0_19, %c0_20], %54 {strides = array<i32>} : memref<1x1xf32, #tpu.memory_space<vmem>>, vector<1x1xf32>,
    %cst_21 = arith.constant dense<0.000000e+00> : vector<1xf32>
    %56 = vector.multi_reduction <add>, %23, %cst_21 [1] : vector<1x128xf32> to vector<1xf32>
    %57 = vector.shape_cast %56 : vector<1xf32> to vector<1x1xf32>
    %58 = vector.broadcast %57 : vector<1x1xf32> to vector<8x1xf32>
    %59 = arith.mulf %21, %58 : vector<8x1xf32>
    %60 = vector.broadcast %23 : vector<1x128xf32> to vector<8x128xf32>
    %61 = arith.mulf %60, %17 : vector<8x128xf32>
    %cst_22 = arith.constant dense<0.000000e+00> : vector<8xf32>
    %62 = vector.multi_reduction <add>, %61, %cst_22 [1] : vector<8x128xf32> to vector<8xf32>
    %63 = vector.shape_cast %62 : vector<8xf32> to vector<8x1xf32>
    %64 = arith.subf %59, %63 : vector<8x1xf32>
    %65 = arith.mulf %64, %13 : vector<8x1xf32>
    %c0_23 = arith.constant 0 : index
    %c0_24 = arith.constant 0 : index
    %66 = vector.load %arg12[%c0_23, %c0_24] : memref<1x1xf32, #tpu.memory_space<vmem>>, vector<1x1xf32>
    %67 = vector.shape_cast %65 : vector<8x1xf32> to vector<1x8x1xf32>
    %cst_25 = arith.constant dense<0.000000e+00> : vector<1xf32>
    %68 = vector.multi_reduction <add>, %67, %cst_25 [1, 2] : vector<1x8x1xf32> to vector<1xf32>
    %69 = vector.shape_cast %68 : vector<1xf32> to vector<1x1x1xf32>
    %70 = vector.extract %69[0, 0, 0] : f32 from vector<1x1x1xf32>
    %71 = vector.broadcast %70 : f32 to vector<1x1xf32>
    %72 = arith.addf %66, %71 : vector<1x1xf32>
    %c0_26 = arith.constant 0 : index
    %c0_27 = arith.constant 0 : index
    %73 = vector.load %arg12[%c0_26, %c0_27] : memref<1x1xf32, #tpu.memory_space<vmem>>, vector<1x1xf32>
    tpu.vector_store %arg12[%c0_26, %c0_27], %72 {strides = array<i32>} : memref<1x1xf32, #tpu.memory_space<vmem>>, vector<1x1xf32>,
    %c0_28 = arith.constant 0 : index
    %c0_29 = arith.constant 0 : index
    %74 = vector.load %arg7[%c0_28, %c0_29] : memref<8x128xf32, #tpu.memory_space<vmem>>, vector<8x128xf32>
    %c0_30 = arith.constant 0 : index
    %c0_31 = arith.constant 0 : index
    %75 = vector.load %arg8[%c0_30, %c0_31] : memref<128x128xf32, #tpu.memory_space<vmem>>, vector<128x128xf32>
    %cst_32 = arith.constant dense<0.000000e+00> : vector<8x128xf32>
    %76 = tpu.matmul %74, %75, %cst_32 {dimension_numbers = #tpu.dot_dimension_numbers<[1], [0], [0], [1], [0, 0, 1, 1], [], []>} : vector<8x128xf32>, vector<128x128xf32>, vector<8x128xf32> -> vector<8x128xf32>
    %c0_33 = arith.constant 0 : index
    %c0_34 = arith.constant 0 : index
    %77 = vector.load %arg4[%c0_33, %c0_34] : memref<1x128xf32, #tpu.memory_space<vmem>>, vector<1x128xf32>
    %78 = vector.broadcast %77 : vector<1x128xf32> to vector<8x128xf32>
    %79 = arith.addf %76, %78 : vector<8x128xf32>
    %c0_35 = arith.constant 0 : index
    %c0_36 = arith.constant 0 : index
    %80 = vector.load %arg6[%c0_35, %c0_36] : memref<8x128xf32, #tpu.memory_space<vmem>>, vector<8x128xf32>
    %cst_37 = arith.constant 0.333333343 : f32
    %81 = vector.broadcast %cst_37 : f32 to vector<8x128xf32>
    %82 = arith.mulf %80, %81 : vector<8x128xf32>
    %cst_38 = arith.constant dense<0xFF800000> : vector<8xf32>
    %83 = vector.multi_reduction <maximumf>, %82, %cst_38 [1] : vector<8x128xf32> to vector<8xf32>
    %84 = vector.shape_cast %83 : vector<8xf32> to vector<8x1xf32>
    %85 = vector.broadcast %84 : vector<8x1xf32> to vector<8x128xf32>
    %86 = arith.subf %82, %85 : vector<8x128xf32>
    %87 = math.exp %86 : vector<8x128xf32>
    %cst_39 = arith.constant dense<0.000000e+00> : vector<8xf32>
    %88 = vector.multi_reduction <add>, %87, %cst_39 [1] : vector<8x128xf32> to vector<8xf32>
    %89 = vector.shape_cast %88 : vector<8xf32> to vector<8x1xf32>
    %90 = math.log %89 : vector<8x1xf32>
    %cst_40 = arith.constant 0.333333343 : f32
    %91 = vector.broadcast %cst_40 : f32 to vector<8x128xf32>
    %92 = arith.mulf %79, %91 : vector<8x128xf32>
    %cst_41 = arith.constant dense<0xFF800000> : vector<8xf32>
    %93 = vector.multi_reduction <maximumf>, %92, %cst_41 [1] : vector<8x128xf32> to vector<8xf32>
    %94 = vector.shape_cast %93 : vector<8xf32> to vector<8x1xf32>
    %95 = vector.broadcast %94 : vector<8x1xf32> to vector<8x128xf32>
    %96 = arith.subf %92, %95 : vector<8x128xf32>
    %97 = math.exp %96 : vector<8x128xf32>
    %cst_42 = arith.constant dense<0.000000e+00> : vector<8xf32>
    %98 = vector.multi_reduction <add>, %97, %cst_42 [1] : vector<8x128xf32> to vector<8xf32>
    %99 = vector.shape_cast %98 : vector<8xf32> to vector<8x1xf32>
    %100 = arith.mulf %86, %97 : vector<8x128xf32>
    %cst_43 = arith.constant dense<0.000000e+00> : vector<8xf32>
    %101 = vector.multi_reduction <add>, %100, %cst_43 [1] : vector<8x128xf32> to vector<8xf32>
    %102 = vector.shape_cast %101 : vector<8xf32> to vector<8x1xf32>
    %103 = tpu.reciprocal %99 {approx = true} : vector<8x1xf32> -> vector<8x1xf32>
    %104 = arith.mulf %102, %103 : vector<8x1xf32>
    %105 = arith.subf %90, %104 : vector<8x1xf32>
    %106 = arith.mulf %105, %13 : vector<8x1xf32>
    %c0_44 = arith.constant 0 : index
    %c0_45 = arith.constant 0 : index
    %107 = vector.load %arg13[%c0_44, %c0_45] : memref<1x1xf32, #tpu.memory_space<vmem>>, vector<1x1xf32>
    %108 = vector.shape_cast %106 : vector<8x1xf32> to vector<1x8x1xf32>
    %cst_46 = arith.constant dense<0.000000e+00> : vector<1xf32>
    %109 = vector.multi_reduction <add>, %108, %cst_46 [1, 2] : vector<1x8x1xf32> to vector<1xf32>
    %110 = vector.shape_cast %109 : vector<1xf32> to vector<1x1x1xf32>
    %111 = vector.extract %110[0, 0, 0] : f32 from vector<1x1x1xf32>
    %112 = vector.broadcast %111 : f32 to vector<1x1xf32>
    %113 = arith.addf %107, %112 : vector<1x1xf32>
    %c0_47 = arith.constant 0 : index
    %c0_48 = arith.constant 0 : index
    %114 = vector.load %arg13[%c0_47, %c0_48] : memref<1x1xf32, #tpu.memory_space<vmem>>, vector<1x1xf32>
    tpu.vector_store %arg13[%c0_47, %c0_48], %113 {strides = array<i32>} : memref<1x1xf32, #tpu.memory_space<vmem>>, vector<1x1xf32>,
    %c0_i32_49 = arith.constant 0 : i32
    %115 = arith.cmpi eq, %arg1, %c0_i32_49 : i32
    %116 = arith.extui %115 : i1 to i32
    %c0_i32_50 = arith.constant 0 : i32
    %117 = arith.cmpi ne, %116, %c0_i32_50 : i32
    scf.if %117 {
      %118 = tpu.iota {dimensions = array<i32: 1>} : vector<8x128xi32>
      %c0_i32_51 = arith.constant 0 : i32
      %119 = vector.broadcast %c0_i32_51 : i32 to vector<8x128xi32>
      %120 = arith.cmpi eq, %118, %119 : vector<8x128xi32>
      %c0_52 = arith.constant 0 : index
      %c0_53 = arith.constant 0 : index
      %121 = vector.load %arg10[%c0_52, %c0_53] : memref<1x1xf32, #tpu.memory_space<vmem>>, vector<1x1xf32>
      %122 = vector.extract %121[0, 0] : f32 from vector<1x1xf32>
      %c1_i32_54 = arith.constant 1 : i32
      %123 = vector.broadcast %c1_i32_54 : i32 to vector<8x128xi32>
      %124 = arith.cmpi eq, %118, %123 : vector<8x128xi32>
      %c0_55 = arith.constant 0 : index
      %c0_56 = arith.constant 0 : index
      %125 = vector.load %arg11[%c0_55, %c0_56] : memref<1x1xf32, #tpu.memory_space<vmem>>, vector<1x1xf32>
      %126 = vector.extract %125[0, 0] : f32 from vector<1x1xf32>
      %c2_i32 = arith.constant 2 : i32
      %127 = vector.broadcast %c2_i32 : i32 to vector<8x128xi32>
      %128 = arith.cmpi eq, %118, %127 : vector<8x128xi32>
      %c0_57 = arith.constant 0 : index
      %c0_58 = arith.constant 0 : index
      %129 = vector.load %arg12[%c0_57, %c0_58] : memref<1x1xf32, #tpu.memory_space<vmem>>, vector<1x1xf32>
      %130 = vector.extract %129[0, 0] : f32 from vector<1x1xf32>
      %c3_i32 = arith.constant 3 : i32
      %131 = vector.broadcast %c3_i32 : i32 to vector<8x128xi32>
      %132 = arith.cmpi eq, %118, %131 : vector<8x128xi32>
      %c0_59 = arith.constant 0 : index
      %c0_60 = arith.constant 0 : index
      %133 = vector.load %arg13[%c0_59, %c0_60] : memref<1x1xf32, #tpu.memory_space<vmem>>, vector<1x1xf32>
      %134 = vector.extract %133[0, 0] : f32 from vector<1x1xf32>
      %cst_61 = arith.constant 0.000000e+00 : f32
      %135 = vector.broadcast %134 : f32 to vector<8x128xf32>
      %136 = vector.broadcast %cst_61 : f32 to vector<8x128xf32>
      %137 = arith.select %132, %135, %136 : vector<8x128xi1>, vector<8x128xf32>
      %138 = vector.broadcast %130 : f32 to vector<8x128xf32>
      %139 = arith.select %128, %138, %137 : vector<8x128xi1>, vector<8x128xf32>
      %140 = vector.broadcast %126 : f32 to vector<8x128xf32>
      %141 = arith.select %124, %140, %139 : vector<8x128xi1>, vector<8x128xf32>
      %142 = vector.broadcast %122 : f32 to vector<8x128xf32>
      %143 = arith.select %120, %142, %141 : vector<8x128xi1>, vector<8x128xf32>
      %c0_62 = arith.constant 0 : index
      %c0_63 = arith.constant 0 : index
      %144 = vector.load %arg9[%c0_62, %c0_63] : memref<8x128xf32, #tpu.memory_space<vmem>>, vector<8x128xf32>
      tpu.vector_store %arg9[%c0_62, %c0_63], %143 {strides = array<i32>} : memref<8x128xf32, #tpu.memory_space<vmem>>, vector<8x128xf32>,
    } else {
    }
    return
  }
  func.func @transform_0(%arg0: i32, %arg1: i32) -> (i32, i32) {
    %c1_i32 = arith.constant 1 : i32
    %0 = arith.muli %arg0, %c1_i32 : i32
    %1 = arith.addi %0, %arg1 : i32
    %c0_i32 = arith.constant 0 : i32
    %c0_i32_0 = arith.constant 0 : i32
    return %1, %c0_i32 : i32, i32
  }
  func.func @transform_1(%arg0: i32, %arg1: i32) -> (i32, i32) {
    %c0_i32 = arith.constant 0 : i32
    %c0_i32_0 = arith.constant 0 : i32
    %c0_i32_1 = arith.constant 0 : i32
    return %c0_i32, %c0_i32_0 : i32, i32
  }
  func.func @transform_2(%arg0: i32, %arg1: i32) -> (i32, i32) {
    %c0_i32 = arith.constant 0 : i32
    %c0_i32_0 = arith.constant 0 : i32
    %c0_i32_1 = arith.constant 0 : i32
    return %c0_i32, %c0_i32_0 : i32, i32
  }
  func.func @transform_3(%arg0: i32, %arg1: i32) -> (i32, i32) {
    %c1_i32 = arith.constant 1 : i32
    %0 = arith.muli %arg0, %c1_i32 : i32
    %1 = arith.addi %0, %arg1 : i32
    %c0_i32 = arith.constant 0 : i32
    %c0_i32_0 = arith.constant 0 : i32
    return %1, %c0_i32 : i32, i32
  }
  func.func @transform_4(%arg0: i32, %arg1: i32) -> (i32, i32) {
    %c1_i32 = arith.constant 1 : i32
    %0 = arith.muli %arg0, %c1_i32 : i32
    %1 = arith.addi %0, %arg1 : i32
    %c0_i32 = arith.constant 0 : i32
    %c0_i32_0 = arith.constant 0 : i32
    return %1, %c0_i32 : i32, i32
  }
  func.func @transform_5(%arg0: i32, %arg1: i32) -> (i32, i32) {
    %c1_i32 = arith.constant 1 : i32
    %0 = arith.muli %arg0, %c1_i32 : i32
    %1 = arith.addi %0, %arg1 : i32
    %c0_i32 = arith.constant 0 : i32
    %c0_i32_0 = arith.constant 0 : i32
    return %1, %c0_i32 : i32, i32
  }
  func.func @transform_6(%arg0: i32, %arg1: i32) -> (i32, i32) {
    %c0_i32 = arith.constant 0 : i32
    %c0_i32_0 = arith.constant 0 : i32
    %c0_i32_1 = arith.constant 0 : i32
    return %c0_i32, %c0_i32_0 : i32, i32
  }
  func.func @transform_7(%arg0: i32, %arg1: i32) -> (i32, i32) {
    %c0_i32 = arith.constant 0 : i32
    %c0_i32_0 = arith.constant 0 : i32
    return %arg0, %c0_i32 : i32, i32
  }
}

</mosaic_0001>

<bundles_post_ra>
// kernel: tpu_custom_call.1
= control target key start
LH: loop header
LB: loop body
LE: loop exit
PB: predicated region body
PF: predicated region fallthrough
CT: control target
= control target key end

     0   :  { %s1349_s0 = inlined_call_operand.vmem [shape: s32[16,1], index: 0, kind: input, shape index: {}]   ;;  %s1350_s1 = inlined_call_operand.vmem [shape: f32[1,128], index: 1, kind: input, shape index: {}]   ;;  %s1351_s2 = inlined_call_operand.vmem [shape: f32[1,128], index: 2, kind: input, shape index: {}]   ;;  %s1352_s3 = inlined_call_operand.vmem [shape: f32[16,128], index: 3, kind: input, shape index: {}]   ;;  %s1353_s4 = inlined_call_operand.hbm [shape: f32[16,128], index: 4, kind: input, shape index: {}]   ;;  %s1354_s5 = inlined_call_operand.hbm [shape: f32[16,128], index: 5, kind: input, shape index: {}]   ;;  %s1355_s6 = inlined_call_operand.hbm [shape: f32[128,128], index: 6, kind: input, shape index: {}]   ;;  %s1356_s7 = inlined_call_operand.hbm [shape: f32[16,128], index: 7, kind: output, shape index: {}]  }
   0x1   :  { %1364 = sst [smem:[#allocation24_spill]] %s1355_s6 }
   0x2   :  { %12 = vsyncpa [#allocation7], 0 }
   0x3   :  { %14 = vsyncpa [#allocation7 + $0x1], 0 }
   0x4   :  { %15 = vsyncpa [#allocation10], 0 }
   0x5   :  { %17 = vsyncpa [#allocation10 + $0x1], 0 }
   0x6   :  { %18 = vsyncpa [#allocation8], 0 }
   0x7   :  { %20 = vsyncpa [#allocation8 + $0x1], 0  ;;  %s1143_s24 = smov 0   ;;  %s1145_s25 = smov 0  }
   0x8   :  { %s1147_s26 = smov 0   ;;  %s1149_s27 = smov 0  }
   0x9   :  { %s1151_s28 = smov 0   ;;  %s1153_s29 = smov 0  }
   0xa LB: > { %1365 = sst [smem:[#allocation17_spill]] %s1076_s24  ;;  %s1174_s30 = sadd.s32 4294967295, %s1096_s29   ;;  %s1096_s29 = sphi %s1153_s29, %s26_s29   ;;  %s1092_s28 = sphi %s1151_s28, %s1384_s28   ;;  %s1088_s27 = sphi %s1149_s27, %s1383_s27   ;;  %s1084_s26 = sphi %s1147_s26, %s1382_s26   ;;  %s1080_s25 = sphi %s1145_s25, %s1386_s25   ;;  %s1076_s24 = sphi %s1143_s24, %s1385_s24  }
   0xb   : > { %1366 = sst [smem:[#allocation18_spill]] %s1084_s26  ;;  %p782_p0 = scmp.ge.s32.totalorder %s1096_s29, 1 }
   0xc   : > { %1367 = sst [smem:[#allocation19_spill]] %s1092_s28  ;;  %p159_p1 = scmp.eq.s32.totalorder %s1174_s30, 0 }
   0xd   : > { %p244_p2 = scmp.lt.s32.totalorder %s1096_s29, 3  ;;  %s1368_s6 = sld [smem:[#allocation24_spill]] }
   0xe   : > { %s1098_s12 = smov [#allocation11]   ;;  %p784_p6 = scmp.ge.s32.totalorder %s1096_s29, 2 }
   0xf   : > { %p1182_p3 = pnand %p782_p0, %p244_p2  ;;  %s263_s13 = sshll.u32 %s1098_s12, 4  ;;  %s264_s13 = int_to_ptr.vmem [resolvable:$true] %s263_s13 }
  0x10   : > { %s1099_s14 = smov 128   ;;  %s1100_s15 = smov 8  }
  0x11   : > { %p828_p4 = pneg %p1182_p3  ;;  %s781_s16 = sadd.s32 4294967294, %s1096_s29  }
  0x12   : > { %s38_s17 = sadd.s32 1, %s1092_s28  ;;  %s145_s18 = sadd.s32 1, %s1084_s26 }
  0x13   : > { %s261_s10 = sshll.u32 %s1368_s6, 4  ;;  %p829_p5 = pnand %p828_p4, %p159_p1  ;;  %s262_s10 = int_to_ptr.hbm [resolvable:$true] %s261_s10 }
  0x14   : > { %p40_p7 = scmp.ge.s32.totalorder %s38_s17, 2  ;;  %p152_p8 = scmp.ne.s32.totalorder %s1084_s26, %s1080_s25 }
  0x15   : > { %831 = dma.hbm_to_vmem [thread:$0]  (!%p829_p5), %s262_s10, 2048, %s264_s13, [#allocation10], %s1099_s14, %s1099_s14, %s1100_s15  }
  0x16   : > { %p153_p9 = scmp.eq.s32.totalorder %s1096_s29, 0  ;;  %p158_p10 = scmp.ne.s32.totalorder %s1080_s25, %s1076_s24 }
  0x17   : > { %s1388_s17 = smov (%p40_p7, %s38_s17), 0  ;;  %p231_p13 = scmp.eq.s32.totalorder %s1174_s30, 1 }
  0x18   : > { %1370 = sst [smem:[#allocation20_spill]] %s1388_s17  ;;  %p1201_p11 = por %p153_p9, %p152_p8 }
  0x19   : > { %p1207_p12 = por %p159_p1, %p158_p10  ;;  %s142_s21 = ssub.s32 %s1092_s28, %s1388_s17 }
  0x1a   : > { %p143_p0 = scmp.eq.s32.totalorder %s142_s21, 0  ;;  %p237_p2 = scmp.eq.s32.totalorder %s781_s16, 1 }
  0x1b   : > { %p1214_p4 = por %p231_p13, %p152_p8  ;;  %p844_p5 = scmp.lt.s32.totalorder %s1096_s29, 2 }
  0x1c   : > { %s1220_s23 = scalar_select %p143_p0, %s1084_s26, %s145_s18  }
  0x1d   : > { %s1373_s22 = scalar_select %p1214_p4, 1, 0 }
  0x1e   : > { %1375 = sst [smem:[#allocation22_spill]] %s1220_s23  ;;  %p1222_p7 = por %p237_p2, %p158_p10 }
  0x1f   : > { %1374 = sst [smem:[#allocation21_spill]] %s1373_s22  ;;  %s295_s9 = sand.u32 1, %s1084_s26  }
  0x20   : > { %s1376_s8 = scalar_select %p1222_p7, 1, 0 }
  0x21   : > { %s785_s10 = sshll.u32 %s295_s9, 3  ;;  %s786_s12 = sshll.u32 %s1092_s28, 3 }
  0x22   : > { %1377 = sst [smem:[#allocation23_spill]] %s1376_s8  ;;  %s304_s15 = scalar_lea.hbm %s1353_s4, %s786_s12 }
  0x23   : > { %s299_s16 = scalar_lea.vmem [#allocation6], %s785_s10  ;;  %s306_s6 = sshll.u32 %s304_s15, 4  ;;  %s307_s6 = int_to_ptr.hbm [resolvable:$true] %s306_s6 }
  0x24   : > { %s308_s21 = sshll.u32 %s299_s16, 4  ;;  %p833_p8 = pnand %p844_p5, %p1201_p11  ;;  %s309_s21 = int_to_ptr.vmem [resolvable:$true] %s308_s21 }
  0x25   : > { %s324_s23 = scalar_lea.hbm %s1354_s5, %s786_s12  ;;  %s315_s24 = sand.u32 1, %s1096_s29  }
  0x26   : > { %s296_s8 = scalar_lea.sflag [#allocation7], %s295_s9  ;;  %s326_s26 = sshll.u32 %s324_s23, 4  ;;  %s327_s26 = int_to_ptr.hbm [resolvable:$true] %s326_s26 }
  0x27   : > { %835 = dma.hbm_to_vmem [thread:$0]  (!%p833_p8), %s307_s6, 128, %s309_s21, %s296_s8  }
  0x28   : > { %s319_s28 = scalar_lea.vmem [#allocation9], %s785_s10  ;;  %s316_s13 = scalar_lea.sflag [#allocation10], %s315_s24 }
  0x29   : > { %s328_s22 = sshll.u32 %s319_s28, 4  ;;  %337 = sbr.rel (%p1182_p3) target bundleno = 740 (0x2e4), region = 48  ;;  %s329_s22 = int_to_ptr.vmem [resolvable:$true] %s328_s22 }
  0x2a   : > { %838 = dma.hbm_to_vmem [thread:$0]  (!%p833_p8), %s327_s26, 128, %s329_s22, %s316_s13  }
  0x2b   : > { %s1240_s19 = sand.u32 (!%p1182_p3), 1, %s1080_s25  }
  0x2c   : > { %s1243_s17 = sshll.u32 (!%p1182_p3), %s1240_s19, 3  ;;  %s340_s6 = scalar_lea.sflag (!%p1182_p3), [#allocation7], %s1240_s19 }
  0x2d   : > { %s343_s23 = scalar_lea.vmem (!%p1182_p3), [#allocation6], %s1243_s17 }
  0x2e   : > { %1059 = dma.done.wait (%p1207_p12), %s340_s6, 128  }
  0x2f   : > { %1061 = vsyncadd (%p1207_p12), %s340_s6, 4294967168  ;;  %s349_s24 = sand.u32 1, %s1174_s30   ;;  %s353_s28 = scalar_lea.vmem [#allocation9], %s1243_s17 }
  0x30   : > { %s350_s26 = scalar_lea.sflag [#allocation10], %s349_s24 }
  0x31   : > { %1063 = dma.done.wait (%p1207_p12), %s350_s26, 128  }
  0x32   : > { %1065 = vsyncadd (%p1207_p12), %s350_s26, 4294967168 }
  0x33   : > { %1067 = dma.done.wait (%p159_p1), [#allocation10], 2048  }
  0x34   : > { %1069 = vsyncadd (%p159_p1), [#allocation10], 4294965248  ;;  %p406_p3 = scmp.lt.s32.totalorder %s1088_s27, 1  ;;  %v539_v0 = vld [vmem:[#allocation11 + $0x78] sm:$0xff]  ;;  %v538_v1 = vld [vmem:[#allocation11 + $0x70] sm:$0xff]  ;;  %v1101_v20 = vmov 0   ;;  %v431_v42 = vlaneseq }
  0x35   : > { %544 = vmatpush.msra.mxu0 %v539_v0  ;;  %v537_v2 = vld [vmem:[#allocation11 + $0x68] sm:$0xff]  ;;  %v536_v3 = vld [vmem:[#allocation11 + $0x60] sm:$0xff]  ;;  %v535_v5 = vld [vmem:[#allocation11 + $0x58] sm:$0xff]  ;;  %900 = vset.pattern.permute.xlu1 %v1101_v20  ;;  %vm498_vm0 = vcmask 1040384   ;;  %s796_s6 = sshll.u32 %s1088_s27, 3  ;;  %v1102_v61 = vmov 0.0  }
  0x36   : > { %s1263_s11 = scalar_select %p406_p3, %s1088_s27, 1  ;;  %v564_v6 = vld [vmem:[%s343_s23] sm:$0xff]  ;;  %v534_v7 = vld [vmem:[#allocation11 + $0x50] sm:$0xff]  ;;  %v531_v11 = vld [vmem:[#allocation11 + $0x38] sm:$0xff]  ;;  %901 = vset.pattern.permute.xlu0 %v1101_v20  ;;  %v1287_v44 = vand.u32 127, %v431_v42  ;;  %v432_v51 = vshrl.u32 %v431_v42, 7  ;;  %v433_v53 = vstv %s796_s6 }
  0x37   : > { %545 = vmatpush.msra.mxu0 %v538_v1  ;;  %v533_v8 = vld [vmem:[#allocation11 + $0x48] sm:$0xff]  ;;  %v565_v9 = vmul.f32 0.33333334, %v564_v6  ;;  %v532_v10 = vld [vmem:[#allocation11 + $0x40] sm:$0xff]  ;;  %v530_v12 = vld [vmem:[#allocation11 + $0x30] sm:$0xff]  ;;  %vm469_vm3 = vcmask 7168  }
  0x38   : > { %s794_s22 = sshll.u32 %s1263_s11, 3  ;;  %v529_v13 = vld [vmem:[#allocation11 + $0x28] sm:$0xff]  ;;  %v528_v14 = vld [vmem:[#allocation11 + $0x20] sm:$0xff]  ;;  %v527_v15 = vld [vmem:[#allocation11 + $0x18] sm:$0xff]  ;;  %v434_v57 = vadd.s32 %v433_v53, %v432_v51  ;;  %vm423_vm4 = vcmask 0   ;;  %vm616_vm5 = vcmp.eq.s32.totalorder %v1287_v44, 3 }
  0x39   : > { %s415_s9 = scalar_lea.vmem %s1352_s3, %s794_s22  ;;  %546 = vmatpush.msra.mxu0 %v537_v2  ;;  %v526_v16 = vld [vmem:[#allocation11 + $0x10] sm:$0xff]  ;;  %v525_v17 = vld [vmem:[#allocation11 + $0x8] sm:$0xff]  ;;  %v524_v18 = vld [vmem:[#allocation11] sm:$0xff]  ;;  %s409_s15 = scalar_lea.vmem %s1349_s0, %s794_s22  ;;  %425 = vst.msk [vmem:[#allocation3] sm:$0x1] %vm423_vm4, %v1102_v61  ;;  %vm613_vm6 = vcmp.eq.s32.totalorder %v1287_v44, 2 }
  0x3a   : > { %v428_v4 = vld [vmem:[%s415_s9] sm:$0xff]  ;;  %vm435_vm2 = vcmp.lt.s32.totalorder %v434_v57, 8  ;;  %424 = vst.msk [vmem:[#allocation2] sm:$0x1] %vm423_vm4, %v1102_v61  ;;  %s639_s9 = scalar_lea.hbm %s1356_s7, %s796_s6  ;;  %vm610_vm7 = vcmp.eq.s32.totalorder %v1287_v44, 1  ;;  %s404_s12 = scalar_lea.vmem [#allocation12], %s1243_s17 }
  0x3b   : > { %438 = vmax.xlane.f32.xlu0 %v428_v4  ;;  %547 = vmatpush.msra.mxu0 %v536_v3  ;;  %v523_v19 = vld [vmem:[%s353_s28] sm:$0xff]  ;;  %v797_v62 = vsel %vm435_vm2, 1.0, %v1102_v61  ;;  %426 = vst.msk [vmem:[#allocation4] sm:$0x1] %vm423_vm4, %v1102_v61  ;;  %s641_s14 = sshll.u32 %s404_s12, 4  ;;  %vm607_vm8 = vcmp.eq.s32.totalorder %v1287_v44, 0  ;;  %s642_s14 = int_to_ptr.vmem [resolvable:$true] %s641_s14 }
  0x3c   : > { %v902_v21 = vld [vmem:[%s1351_s2] ss:$0 sm:$0xff]  ;;  %427 = vst.msk [vmem:[#allocation5] sm:$0x1] %vm423_vm4, %v1102_v61  ;;  %s629_s16 = scalar_lea.sflag [#allocation8], %s1240_s19  ;;  %s1026_s6 = scalar_lea.hbm %s1356_s7, 16 }
  0x3d   : > { %548 = vmatpush.msra.mxu0 %v535_v5  ;;  %v447_v33 = vld [vmem:[%s409_s15] sm:$0xff]  ;;  %s643_s15 = sshll.u32 %s639_s9, 4  ;;  %s644_s15 = int_to_ptr.hbm [resolvable:$true] %s643_s15 }
  0x3e   : > { %v448_v34 = vld [vmem:[%s1350_s1] sm:$0x1]  ;;  %s1020_s21 = sshra.s32 %s644_s15, 4  ;;  %s1021_s21 = int_to_ptr.hbm [resolvable:$true] %s1020_s21 }
  0x3f   : > { %549 = vmatpush.msra.mxu0 %v534_v7  ;;  %v499_v35 = vsel %vm498_vm0, %v448_v34, 0.0  ;;  %v903_v41 = vld [vmem:[%s1350_s1] ss:$0 sm:$0xff]  ;;  %s1022_s18 = scalar_lea.hbm %s1021_s21, 8  ;;  %p1027_p11 = scmp.lt.s32.totalorder %s1021_s21, %s1356_s7 }
  0x40   : > { %p1023_p1 = scmp.ne.s32.totalorder %s1021_s21, %s1022_s18  ;;  %p1028_p12 = scmp.lt.s32.totalorder %s1026_s6, %s1022_s18 }
  0x41   : > { %550 = vmatpush.msra.mxu0 %v533_v8 }
  0x42   : > { %p1024_p9 = pnand %p1023_p1, %p1214_p4  ;;  %p1029_p13 = por %p1028_p12, %p1027_p11 }
  0x43   : > { %566 = vmax.xlane.f32.xlu0 %v565_v9  ;;  %551 = vmatpush.msra.mxu0 %v532_v10 }
  0x44   : > { %p1025_p10 = pneg %p1024_p9 }
  0x45   : > { %552 = vmatpush.msra.mxu0 %v531_v11 }
  0x46   : > { %p1030_p0 = pnand %p1029_p13, %p1025_p10 }
  0x47   : > { %553 = vmatpush.msra.mxu0 %v530_v12 }
  0x49   : > { %554 = vmatpush.msra.mxu0 %v529_v13 }
  0x4b   : > { %555 = vmatpush.msra.mxu0 %v528_v14 }
  0x4d   : > { %556 = vmatpush.msra.mxu0 %v527_v15 }
  0x4f   : > { %557 = vmatpush.msra.mxu0 %v526_v16 }
  0x51   : > { %558 = vmatpush.msra.mxu0 %v525_v17 }
  0x53   : > { %559 = vmatpush.msra.mxu0 %v524_v18 }
  0x54   : > { %560 = vmatmul.f32.vlgmr.msra.gmra.mxu0 %v523_v19 }
  0xae   : > { %v439_v22 = vpop.xlane.xlu0 %438 }
  0xaf   : > { %v440_v23 = vsub.f32 %v428_v4, %v439_v22 }
  0xb1   : > { %v441_v26 = vmul.f32 1.442695, %v440_v23  ;;  %v504_v43 = vmul.f32 %v903_v41, %v440_v23 }
  0xb3   : > { %904 = vpow2.f32 %v441_v26 }
  0xb6   : > { %v567_v28 = vpop.xlane.xlu0 %566 }
  0xb7   : > { %v568_v29 = vsub.f32 %v565_v9, %v567_v28 }
  0xb9   : > { %v905_v30 = vpop.eup %904  ;;  %v569_v31 = vmul.f32 1.442695, %v568_v29 }
  0xba   : > { %443 = vadd.xlane.f32.xlu2 %v905_v30 }
  0xbb   : > { %906 = vpow2.f32 %v569_v31 }
  0xc1   : > { %v907_v32 = vpop.eup %906 }
  0xc2   : > { %571 = vadd.xlane.f32.xlu2 %v907_v32 }
  0xca   : > { %500 = vadd.xlane.f32.xlu2 %v499_v35 }
  0xd1   : > { %v561_v24 = vpop.f32.mrf.mxu0 }
  0xd2   : > { %v562_v25 = vadd.f32 %v902_v21, %v561_v24 }
  0xd4   : > { %v575_v27 = vmul.f32 0.33333334, %v562_v25 }
  0xd6   : > { %576 = vmax.xlane.f32.xlu1 %v575_v27 }
  0xef   : > { %452 = vperm.xlu1 %900, %v447_v33  }
 0x12d   : > { %v444_v48 = vpop.xlane.xlu2 %443 }
 0x135   : > { %v572_v49 = vpop.xlane.xlu2 %571 }
 0x13d   : > { %v501_v50 = vpop.xlane.xlu2 %500 }
 0x13e   : > { %v502_v56 = vperm.slane %v501_v50, 0  ;;  %v509_v50 = vld [vmem:[#allocation4] sm:$0x1] }
 0x149   : > { %v577_v36 = vpop.xlane.xlu1 %576 }
 0x14a   : > { %v578_v37 = vsub.f32 %v575_v27, %v577_v36 }
 0x14c   : > { %v579_v38 = vmul.f32 1.442695, %v578_v37 }
 0x14e   : > { %908 = vpow2.f32 %v579_v38 }
 0x14f   : > { %910 = vlog2.f32 %v444_v48 }
 0x150   : > { %912 = vlog2.f32 %v572_v49  ;;  %v484_v49 = vld [vmem:[#allocation2] sm:$0x1] }
 0x154   : > { %v909_v39 = vpop.eup %908 }
 0x155   : > { %581 = vadd.xlane.f32.xlu0 %v909_v39  ;;  %v583_v40 = vmul.f32 %v909_v39, %v568_v29  ;;  %v911_v52 = vpop.eup %910 }
 0x156   : > { %v446_v55 = vmul.f32 0.6931472, %v911_v52  ;;  %v913_v5 = vpop.eup %912 }
 0x157   : > { %584 = vadd.xlane.f32.xlu2 %v583_v40  ;;  %v574_v9 = vmul.f32 0.6931472, %v913_v5 }
 0x158   : > { %v503_v59 = vmul.f32 %v502_v56, %v446_v55 }
 0x15f   : > { %505 = vadd.xlane.f32.xlu2 %v504_v43 }
 0x161   : > { %v453_v45 = vpop.permute.xlu1 %452 }
 0x162   : > { %vm454_vm1 = vcmp.eq.s32.totalorder %v1287_v44, %v453_v45 }
 0x163   : > { %v458_v46 = vsel %vm454_vm1, %v903_v41, 0.0 }
 0x164   : > { %459 = vadd.xlane.f32.xlu0 %v458_v46  ;;  %v462_v47 = vmul.f32 %v458_v46, %v440_v23  ;;  %v468_v46 = vld [vmem:[#allocation3] sm:$0x1] }
 0x16c   : > { %463 = vadd.xlane.f32.xlu0 %v462_v47 }
 0x1c8   : > { %v582_v58 = vpop.xlane.xlu0 %581 }
 0x1c9   : > { %914 = vrcp.f32 %v582_v58 }
 0x1ca   : > { %v585_v54 = vpop.xlane.xlu2 %584 }
 0x1cf   : > { %v915_v6 = vpop.eup %914 }
 0x1d0   : > { %v587_v10 = vmul.f32 %v915_v6, %v585_v54 }
 0x1d2   : > { %v506_v60 = vpop.xlane.xlu2 %505  ;;  %v588_v13 = vsub.f32 %v574_v9, %v587_v10 }
 0x1d3   : > { %v507_v63 = vsub.f32 %v503_v59, %v506_v60 }
 0x1d4   : > { %v589_v15 = vmul.f32 %v797_v62, %v588_v13 }
 0x1d5   : > { %v508_v0 = vmul.f32 %v797_v62, %v507_v63 }
 0x1d6   : > { %v591_v16 = vsel %vm469_vm3, %v589_v15, 0.0 }
 0x1d7   : > { %v460_v1 = vpop.xlane.xlu0 %459  ;;  %v510_v2 = vsel %vm469_vm3, %v508_v0, 0.0 }
 0x1d8   : > { %v466_v3 = vmul.f32 %v797_v62, %v460_v1  ;;  %511 = vadd.xlane.f32.xlu2 %v510_v2  ;;  %v461_v7 = vmul.f32 %v460_v1, %v446_v55  ;;  %v590_v55 = vld [vmem:[#allocation5] sm:$0x1] }
 0x1da   : > { %v470_v4 = vsel %vm469_vm3, %v466_v3, 0.0 }
 0x1db   : > { %471 = vadd.xlane.f32.xlu1 %v470_v4 }
 0x1df   : > { %v464_v8 = vpop.xlane.xlu0 %463 }
 0x1e0   : > { %v465_v11 = vsub.f32 %v461_v7, %v464_v8 }
 0x1e2   : > { %v467_v12 = vmul.f32 %v797_v62, %v465_v11 }
 0x1e4   : > { %v485_v14 = vsel %vm469_vm3, %v467_v12, 0.0 }
 0x1e5   : > { %486 = vadd.xlane.f32.xlu0 %v485_v14 }
 0x1ed   : > { %592 = vadd.xlane.f32.xlu0 %v591_v16 }
 0x24b   : > { %v512_v17 = vpop.xlane.xlu2 %511 }
 0x24c   : > { %v513_v20 = vrot.slane %v512_v17, 4 }
 0x24e   : > { %v472_v18 = vpop.xlane.xlu1 %471  ;;  %v514_v23 = vadd.f32 %v513_v20, %v512_v17 }
 0x24f   : > { %v473_v19 = vrot.slane %v472_v18, 4 }
 0x250   : > { %v515_v26 = vrot.slane %v514_v23, 2 }
 0x251   : > { %v474_v21 = vadd.f32 %v473_v19, %v472_v18 }
 0x252   : > { %v516_v31 = vadd.f32 %v515_v26, %v514_v23 }
 0x253   : > { %v475_v22 = vrot.slane %v474_v21, 2 }
 0x254   : > { %v517_v35 = vrot.slane %v516_v31, 1 }
 0x255   : > { %v476_v24 = vadd.f32 %v475_v22, %v474_v21 }
 0x256   : > { %v518_v40 = vadd.f32 %v517_v35, %v516_v31 }
 0x257   : > { %v477_v25 = vrot.slane %v476_v24, 1 }
 0x258   : > { %v487_v27 = vpop.xlane.xlu0 %486 }
 0x259   : > { %v488_v28 = vrot.slane %v487_v27, 4  ;;  %v478_v29 = vadd.f32 %v477_v25, %v476_v24 }
 0x25b   : > { %v489_v30 = vadd.f32 %v488_v28, %v487_v27  ;;  %802 = vpush %v478_v29 }
 0x25d   : > { %v490_v32 = vrot.slane %v489_v30, 2 }
 0x25f   : > { %v491_v33 = vadd.f32 %v490_v32, %v489_v30 }
 0x260   : > { %v593_v34 = vpop.xlane.xlu0 %592 }
 0x261   : > { %v594_v36 = vrot.slane %v593_v34, 4  ;;  %v492_v37 = vrot.slane %v491_v33, 1 }
 0x263   : > { %v595_v38 = vadd.f32 %v594_v36, %v593_v34  ;;  %v493_v39 = vadd.f32 %v492_v37, %v491_v33 }
 0x265   : > { %v596_v41 = vrot.slane %v595_v38, 2  ;;  %804 = vpush %v493_v39 }
 0x266   : > { %806 = vpush %v518_v40 }
 0x267   : > { %v597_v42 = vadd.f32 %v596_v41, %v595_v38 }
 0x269   : > { %v598_v43 = vrot.slane %v597_v42, 1 }
 0x26b   : > { %v599_v45 = vadd.f32 %v598_v43, %v597_v42 }
 0x26d   : > { %808 = vpush %v599_v45 }
 0x28c   : > { %s803_s23 = spop %802 }
 0x28d   : > { %v480_v47 = vstv %s803_s23 }
 0x28e   : > { %v481_v48 = vadd.f32 %v480_v47, %v468_v46 }
 0x290   : > { %483 = vst.msk [vmem:[#allocation3] sm:$0x1] %vm423_vm4, %v481_v48 }
 0x296   : > { %s805_s24 = spop %804 }
 0x297   : > { %v495_v51 = vstv %s805_s24  ;;  %s807_s26 = spop %806  ;;  %v611_v60 = vld [vmem:[#allocation3] sm:$0x1] }
 0x298   : > { %v496_v52 = vadd.f32 %v495_v51, %v484_v49  ;;  %v520_v53 = vstv %s807_s26 }
 0x299   : > { %v521_v54 = vadd.f32 %v520_v53, %v509_v50 }
 0x29a   : > { %497 = vst.msk [vmem:[#allocation2] sm:$0x1] %vm423_vm4, %v496_v52 }
 0x29b   : > { %522 = vst.msk [vmem:[#allocation4] sm:$0x1] %vm423_vm4, %v521_v54 }
 0x29e   : > { %s809_s28 = spop %808 }
 0x29f   : > { %v601_v56 = vstv %s809_s28 }
 0x2a0   : > { %v602_v57 = vadd.f32 %v601_v56, %v590_v55 }
 0x2a1   : > { %v608_v58 = vld [vmem:[#allocation2] sm:$0x1] }
 0x2a2   : > { %603 = vst.msk [vmem:[#allocation5] sm:$0x1] %vm423_vm4, %v602_v57  ;;  %v614_v59 = vld [vmem:[#allocation4] sm:$0x1] }
 0x2a3   : > { %810 = vpush %v608_v58 }
 0x2a4   : > { %812 = vpush %v611_v60 }
 0x2a5   : > { %814 = vpush %v614_v59 }
 0x2a9   : > { %v617_v61 = vld [vmem:[#allocation5] sm:$0x1] }
 0x2aa   : > { %816 = vpush %v617_v61 }
 0x2d4   : > { %s811_s11 = spop %810 }
 0x2d5   : > { %s813_s22 = spop %812  ;;  %v625_v3 = vstv %s811_s11 }
 0x2d6   : > { %s815_s30 = spop %814  ;;  %v623_v1 = vstv %s813_s22 }
 0x2d7   : > { %v621_v63 = vstv %s815_s30 }
 0x2db   : > { %s817_s10 = spop %816 }
 0x2dc   : > { %v619_v62 = vstv %s817_s10 }
 0x2dd   : > { %v620_v0 = vsel %vm616_vm5, %v619_v62, 0.0 }
 0x2de   : > { %v622_v2 = vsel %vm613_vm6, %v621_v63, %v620_v0 }
 0x2df   : > { %v624_v4 = vsel %vm610_vm7, %v623_v1, %v622_v2 }
 0x2e0   : > { %v626_v5 = vsel %vm607_vm8, %v625_v3, %v624_v4 }
 0x2e1   : > { %627 = vst [vmem:[%s404_s12] sm:$0xff] %v626_v5 }
 0x2e2   : > { %1033 = shalt.err (!%p1030_p0)
}
 0x2e3   : > { %826 = dma.vmem_to_hbm [thread:$0]  (%p1214_p4), %s642_s14, 128, %s644_s15, %s629_s16  }
 0x2e4 PF: > { %s1379_s19 = sld [smem:[#allocation17_spill]]  ;;  %p840_p2 = pnand %p784_p6, %p1222_p7 }
 0x2e6   : > { %p841_p5 = pneg %p840_p2 }
 0x2ea   : > { %s655_s28 = sand.u32 1, %s1379_s19  }
 0x2eb   : > { %s656_s11 = scalar_lea.sflag [#allocation8], %s655_s28 }
 0x2ec   : > { %1071 = dma.done.wait (%p841_p5), %s656_s11, 128  }
 0x2ed   : > { %1073 = vsyncadd (%p841_p5), %s656_s11, 4294967168  ;;  %s26_s29 = sadd.s32 1, %s1096_s29   ;;  %s1381_s22 = sld [smem:[#allocation18_spill]] }
 0x2ee   : > { %p23_p8 = scmp.ge.s32.totalorder %s26_s29, 4   ;;  %s1382_s26 = sld [smem:[#allocation22_spill]] }
 0x2ef   : > { %s1383_s27 = sld [smem:[#allocation19_spill]]  ;;  %s1385_s24 = smov %s1080_s25 }
 0x2f0   : > { %s1384_s28 = sld [smem:[#allocation20_spill]]  ;;  %25 = sbr.rel (!%p23_p8) target bundleno = 10 (0xa), region = 124 }
 0x2f3   : > { %s1386_s25 = smov %s1381_s22 }
 0x2f5   :  { %662 = vsyncpa [#allocation7], 1 }
 0x2f6   :  { %664 = vsyncpa [#allocation7 + $0x1], 1 }
 0x2f7   :  { %665 = vsyncpa [#allocation10], 1 }
 0x2f8   :  { %667 = vsyncpa [#allocation10 + $0x1], 1 }
 0x2f9   :  { %668 = vsyncpa [#allocation8], 1 }
 0x2fa   :  { %670 = vsyncpa [#allocation8 + $0x1], 1 }

</bundles_post_ra>
